<compile_context>
chip_gen: v7x
topology: tpu7x:2x2x1
jax: 0.10.0
libtpu: 0.0.40
codegen_flags: <defaults>
</compile_context>

<pallas_src>
import functools

import jax
import jax.numpy as jnp
from jax.experimental import pallas as pl
from jax.experimental.pallas import tpu as pltpu


def _round_up(n: int, m: int) -> int:
    return ((n + m - 1) // m) * m


def mlp_kernel(x_ref, w1_ref, b1_ref, w2_ref, b2_ref, w3_ref, b3_ref, o_ref):
    # x_ref: (TB, Fp) bf16; weights bf16 (pre-transposed to (in, out)); biases f32.
    x = x_ref[...]
    h1 = jnp.dot(x, w1_ref[...], preferred_element_type=jnp.float32) + b1_ref[...]
    h1 = jnp.maximum(h1, 0.0).astype(jnp.bfloat16)      # ReLU, back to bf16 for the MXU
    h2 = jnp.dot(h1, w2_ref[...], preferred_element_type=jnp.float32) + b2_ref[...]
    h2 = jnp.maximum(h2, 0.0).astype(jnp.bfloat16)      # ReLU
    h3 = jnp.dot(h2, w3_ref[...], preferred_element_type=jnp.float32) + b3_ref[...]
    o_ref[...] = h3.astype(o_ref.dtype)


def mlp_forward(x, params, *, batch_tile=512):
    """x: (B, ...) float32 (trailing dims flattened). params: torch-convention
    weights (out, in) and biases (out,)."""
    # nn.Flatten: collapse all trailing dims into the feature axis.
    if x.ndim > 2:
        x = x.reshape(x.shape[0], -1)
    B, F = x.shape
    L, F_in = params["w1"].shape
    assert F_in == F, f"feature mismatch: x has {F}, w1 expects {F_in}"

    # Pad feature / label dims to 128 lanes, batch to a multiple of the tile.
    Fp = _round_up(F, 128)
    Lp = _round_up(L, 128)
    tb = _round_up(min(batch_tile, _round_up(B, 8)), 8)
    Bp = _round_up(B, tb)
    grid = (Bp // tb,)

    bf16 = jnp.bfloat16

    def pad2(a, rows, cols, dtype):
        a = a.astype(dtype)
        if a.shape == (rows, cols):
            return a                      # already aligned: no extra HBM copy
        return jnp.zeros((rows, cols), dtype).at[: a.shape[0], : a.shape[1]].set(a)

    # Zero-padded, bf16-cast operands (one-time cost outside the kernel).
    xp = pad2(x, Bp, Fp, bf16)
    w1t = pad2(params["w1"].T, Fp, Lp, bf16)
    w2t = pad2(params["w2"].T, Lp, Lp, bf16)
    w3t = pad2(params["w3"].T, Lp, Lp, bf16)
    b1 = pad2(params["b1"].reshape(1, L), 1, Lp, jnp.float32)
    b2 = pad2(params["b2"].reshape(1, L), 1, Lp, jnp.float32)
    b3 = pad2(params["b3"].reshape(1, L), 1, Lp, jnp.float32)
    # Note: padded weight columns / bias entries are zero, so padded lanes stay
    # exactly zero through both ReLUs and never leak into the sliced output.

    # Grid-invariant operands: fetched once, single-buffered (no double-buffer VMEM).
    resident = functools.partial(pl.BlockSpec, pipeline_mode=pl.Buffered(1))

    in_specs = [
        pl.BlockSpec((tb, Fp), lambda i: (i, 0)),   # x tile per grid step
        resident((Fp, Lp), lambda i: (0, 0)),       # w1^T
        resident((1, Lp), lambda i: (0, 0)),        # b1
        resident((Lp, Lp), lambda i: (0, 0)),       # w2^T
        resident((1, Lp), lambda i: (0, 0)),        # b2
        resident((Lp, Lp), lambda i: (0, 0)),       # w3^T
        resident((1, Lp), lambda i: (0, 0)),        # b3
    ]
    out_spec = pl.BlockSpec((tb, Lp), lambda i: (i, 0))

    # VMEM budget: single-buffered weights/biases + double-buffered x/out tiles
    # + f32 intermediates; doubled for headroom, capped at 64 MiB (fits v7x).
    # TODO(synk): for very large F, K-tile the first matmul instead of keeping
    # the full (Fp, Lp) w1 block resident.
    w_bytes = (Fp * Lp + 2 * Lp * Lp) * 2 + 3 * Lp * 4
    io_bytes = 2 * (tb * Fp * 2 + tb * Lp * 4)
    act_bytes = 3 * tb * Lp * 4
    vmem_limit = int(min(max(2 * (w_bytes + io_bytes + act_bytes), 32 << 20), 64 << 20))

    flops = 2 * Bp * (Fp * Lp + 2 * Lp * Lp)
    bytes_accessed = (
        Bp * Fp * 2                       # x (bf16)
        + (Fp * Lp + 2 * Lp * Lp) * 2     # weights (bf16)
        + 3 * Lp * 4                      # biases (f32)
        + Bp * Lp * 4                     # output (f32)
    )
    cost = pl.CostEstimate(flops=flops, transcendentals=0, bytes_accessed=bytes_accessed)

    out_padded = pl.pallas_call(
        mlp_kernel,
        out_shape=jax.ShapeDtypeStruct((Bp, Lp), jnp.float32),
        grid_spec=pltpu.PrefetchScalarGridSpec(
            num_scalar_prefetch=0,
            grid=grid,
            in_specs=in_specs,
            out_specs=out_spec,
        ),
        compiler_params=pltpu.CompilerParams(
            dimension_semantics=("parallel",),
            vmem_limit_bytes=vmem_limit,
        ),
        cost_estimate=cost,
    )(xp, w1t, b1, w2t, b2, w3t, b3)

    if Bp == B and Lp == L:
        return out_padded
    return out_padded[:B, :L]


def init_params(key, feature_num, label_num):
    """Deterministic init matching the torch module's parameter shapes
    (nn.Linear weight: (out_features, in_features), bias: (out_features,))."""
    ks = jax.random.split(key, 6)

    def lin_init(kw, kb, fan_in, fan_out):
        bound = 1.0 / jnp.sqrt(fan_in)
        w = jax.random.uniform(kw, (fan_out, fan_in), jnp.float32, -bound, bound)
        b = jax.random.uniform(kb, (fan_out,), jnp.float32, -bound, bound)
        return w, b

    w1, b1 = lin_init(ks[0], ks[1], feature_num, label_num)
    w2, b2 = lin_init(ks[2], ks[3], label_num, label_num)
    w3, b3 = lin_init(ks[4], ks[5], label_num, label_num)
    return {"w1": w1, "b1": b1, "w2": w2, "b2": b2, "w3": w3, "b3": b3}


def mlp_reference(x, params):
    if x.ndim > 2:
        x = x.reshape(x.shape[0], -1)
    h1 = jnp.maximum(x @ params["w1"].T + params["b1"], 0.0)
    h2 = jnp.maximum(h1 @ params["w2"].T + params["b2"], 0.0)
    return h2 @ params["w3"].T + params["b3"]


if __name__ == "__main__":
    # hidden_num is an unused constructor arg in the torch module; omitted here.
    batch, feature_num, label_num = 16, 32, 16

    key = jax.random.PRNGKey(0)
    kx, kp = jax.random.split(key)
    x = jax.random.normal(kx, (batch, feature_num), jnp.float32)
    params = init_params(kp, feature_num, label_num)

    out = jax.jit(mlp_forward)(x, params)
    out = jax.block_until_ready(out)

    ref = mlp_reference(x, params)
    assert out.shape == (batch, label_num)
    # bf16 inputs / f32 accumulation: loosened tolerance vs the f32 reference.
    assert jnp.allclose(out, ref, atol=5e-2, rtol=5e-2), "mismatch vs reference"

    print("KERNEL_OK")
</pallas_src>

<mosaic_0001>
module attributes {stable_mosaic.version = 11 : i64} {
  func.func @mlp_kernel(%arg0: i32, %arg1: memref<16x128xbf16, #tpu.memory_space<vmem>>, %arg2: memref<128x128xbf16, #tpu.memory_space<vmem>>, %arg3: memref<1x128xf32, #tpu.memory_space<vmem>>, %arg4: memref<128x128xbf16, #tpu.memory_space<vmem>>, %arg5: memref<1x128xf32, #tpu.memory_space<vmem>>, %arg6: memref<128x128xbf16, #tpu.memory_space<vmem>>, %arg7: memref<1x128xf32, #tpu.memory_space<vmem>>, %arg8: memref<16x128xf32, #tpu.memory_space<vmem>>) attributes {dimension_semantics = [#tpu.dimension_semantics<parallel>], iteration_bounds = array<i64: 1>, scalar_prefetch = 0 : i64, scratch_operands = 0 : i64, tpu.core_type = #tpu.core_type<tc>, window_params = [{transform_indices = @transform_0, window_bounds = array<i64: 16, 128>}, {pipeline_mode = #tpu.pipeline_mode<synchronous>, transform_indices = @transform_1, window_bounds = array<i64: 128, 128>}, {pipeline_mode = #tpu.pipeline_mode<synchronous>, transform_indices = @transform_2, window_bounds = array<i64: 1, 128>}, {pipeline_mode = #tpu.pipeline_mode<synchronous>, transform_indices = @transform_3, window_bounds = array<i64: 128, 128>}, {pipeline_mode = #tpu.pipeline_mode<synchronous>, transform_indices = @transform_4, window_bounds = array<i64: 1, 128>}, {pipeline_mode = #tpu.pipeline_mode<synchronous>, transform_indices = @transform_5, window_bounds = array<i64: 128, 128>}, {pipeline_mode = #tpu.pipeline_mode<synchronous>, transform_indices = @transform_6, window_bounds = array<i64: 1, 128>}, {transform_indices = @transform_7, window_bounds = array<i64: 16, 128>}]} {
    %c0 = arith.constant 0 : index
    %c0_0 = arith.constant 0 : index
    %0 = vector.load %arg1[%c0, %c0_0] : memref<16x128xbf16, #tpu.memory_space<vmem>>, vector<16x128xbf16>
    %c0_1 = arith.constant 0 : index
    %c0_2 = arith.constant 0 : index
    %1 = vector.load %arg2[%c0_1, %c0_2] : memref<128x128xbf16, #tpu.memory_space<vmem>>, vector<128x128xbf16>
    %cst = arith.constant dense<0.000000e+00> : vector<16x128xf32>
    %2 = tpu.matmul %0, %1, %cst {dimension_numbers = #tpu.dot_dimension_numbers<[1], [0], [0], [1], [0, 0, 1, 1], [], []>} : vector<16x128xbf16>, vector<128x128xbf16>, vector<16x128xf32> -> vector<16x128xf32>
    %c0_3 = arith.constant 0 : index
    %c0_4 = arith.constant 0 : index
    %3 = vector.load %arg3[%c0_3, %c0_4] : memref<1x128xf32, #tpu.memory_space<vmem>>, vector<1x128xf32>
    %4 = vector.broadcast %3 : vector<1x128xf32> to vector<16x128xf32>
    %5 = arith.addf %2, %4 : vector<16x128xf32>
    %cst_5 = arith.constant 0.000000e+00 : f32
    %6 = vector.broadcast %cst_5 : f32 to vector<16x128xf32>
    %7 = arith.maximumf %5, %6 : vector<16x128xf32>
    %8 = arith.truncf %7 : vector<16x128xf32> to vector<16x128xbf16>
    %c0_6 = arith.constant 0 : index
    %c0_7 = arith.constant 0 : index
    %9 = vector.load %arg4[%c0_6, %c0_7] : memref<128x128xbf16, #tpu.memory_space<vmem>>, vector<128x128xbf16>
    %cst_8 = arith.constant dense<0.000000e+00> : vector<16x128xf32>
    %10 = tpu.matmul %8, %9, %cst_8 {dimension_numbers = #tpu.dot_dimension_numbers<[1], [0], [0], [1], [0, 0, 1, 1], [], []>} : vector<16x128xbf16>, vector<128x128xbf16>, vector<16x128xf32> -> vector<16x128xf32>
    %c0_9 = arith.constant 0 : index
    %c0_10 = arith.constant 0 : index
    %11 = vector.load %arg5[%c0_9, %c0_10] : memref<1x128xf32, #tpu.memory_space<vmem>>, vector<1x128xf32>
    %12 = vector.broadcast %11 : vector<1x128xf32> to vector<16x128xf32>
    %13 = arith.addf %10, %12 : vector<16x128xf32>
    %cst_11 = arith.constant 0.000000e+00 : f32
    %14 = vector.broadcast %cst_11 : f32 to vector<16x128xf32>
    %15 = arith.maximumf %13, %14 : vector<16x128xf32>
    %16 = arith.truncf %15 : vector<16x128xf32> to vector<16x128xbf16>
    %c0_12 = arith.constant 0 : index
    %c0_13 = arith.constant 0 : index
    %17 = vector.load %arg6[%c0_12, %c0_13] : memref<128x128xbf16, #tpu.memory_space<vmem>>, vector<128x128xbf16>
    %cst_14 = arith.constant dense<0.000000e+00> : vector<16x128xf32>
    %18 = tpu.matmul %16, %17, %cst_14 {dimension_numbers = #tpu.dot_dimension_numbers<[1], [0], [0], [1], [0, 0, 1, 1], [], []>} : vector<16x128xbf16>, vector<128x128xbf16>, vector<16x128xf32> -> vector<16x128xf32>
    %c0_15 = arith.constant 0 : index
    %c0_16 = arith.constant 0 : index
    %19 = vector.load %arg7[%c0_15, %c0_16] : memref<1x128xf32, #tpu.memory_space<vmem>>, vector<1x128xf32>
    %20 = vector.broadcast %19 : vector<1x128xf32> to vector<16x128xf32>
    %21 = arith.addf %18, %20 : vector<16x128xf32>
    %c0_17 = arith.constant 0 : index
    %c0_18 = arith.constant 0 : index
    %22 = vector.load %arg8[%c0_17, %c0_18] : memref<16x128xf32, #tpu.memory_space<vmem>>, vector<16x128xf32>
    tpu.vector_store %arg8[%c0_17, %c0_18], %21 {strides = array<i32>} : memref<16x128xf32, #tpu.memory_space<vmem>>, vector<16x128xf32>,
    return
  }
  func.func @transform_0(%arg0: i32) -> (i32, i32) {
    %c0_i32 = arith.constant 0 : i32
    %c0_i32_0 = arith.constant 0 : i32
    return %arg0, %c0_i32 : i32, i32
  }
  func.func @transform_1(%arg0: i32) -> (i32, i32) {
    %c0_i32 = arith.constant 0 : i32
    %c0_i32_0 = arith.constant 0 : i32
    %c0_i32_1 = arith.constant 0 : i32
    return %c0_i32, %c0_i32_0 : i32, i32
  }
  func.func @transform_2(%arg0: i32) -> (i32, i32) {
    %c0_i32 = arith.constant 0 : i32
    %c0_i32_0 = arith.constant 0 : i32
    %c0_i32_1 = arith.constant 0 : i32
    return %c0_i32, %c0_i32_0 : i32, i32
  }
  func.func @transform_3(%arg0: i32) -> (i32, i32) {
    %c0_i32 = arith.constant 0 : i32
    %c0_i32_0 = arith.constant 0 : i32
    %c0_i32_1 = arith.constant 0 : i32
    return %c0_i32, %c0_i32_0 : i32, i32
  }
  func.func @transform_4(%arg0: i32) -> (i32, i32) {
    %c0_i32 = arith.constant 0 : i32
    %c0_i32_0 = arith.constant 0 : i32
    %c0_i32_1 = arith.constant 0 : i32
    return %c0_i32, %c0_i32_0 : i32, i32
  }
  func.func @transform_5(%arg0: i32) -> (i32, i32) {
    %c0_i32 = arith.constant 0 : i32
    %c0_i32_0 = arith.constant 0 : i32
    %c0_i32_1 = arith.constant 0 : i32
    return %c0_i32, %c0_i32_0 : i32, i32
  }
  func.func @transform_6(%arg0: i32) -> (i32, i32) {
    %c0_i32 = arith.constant 0 : i32
    %c0_i32_0 = arith.constant 0 : i32
    %c0_i32_1 = arith.constant 0 : i32
    return %c0_i32, %c0_i32_0 : i32, i32
  }
  func.func @transform_7(%arg0: i32) -> (i32, i32) {
    %c0_i32 = arith.constant 0 : i32
    %c0_i32_0 = arith.constant 0 : i32
    return %arg0, %c0_i32 : i32, i32
  }
}

</mosaic_0001>

<bundles_post_ra>
// kernel: mlp_forward.1
= control target key start
LH: loop header
LB: loop body
LE: loop exit
PB: predicated region body
PF: predicated region fallthrough
CT: control target
= control target key end

     0   :  { %v565_v1 = vmov 0.0   ;;  %vm566_vm0 = vmmov 0   ;;  %s736_s0 = inlined_call_operand.vmem [shape: bf16[16,128], index: 0, kind: input, shape index: {}]   ;;  %s737_s1 = inlined_call_operand.vmem [shape: bf16[128,128], index: 1, kind: input, shape index: {}]   ;;  %s738_s2 = inlined_call_operand.vmem [shape: f32[1,128], index: 2, kind: input, shape index: {}]   ;;  %s739_s3 = inlined_call_operand.vmem [shape: bf16[128,128], index: 3, kind: input, shape index: {}]   ;;  %s740_s4 = inlined_call_operand.vmem [shape: f32[1,128], index: 4, kind: input, shape index: {}]   ;;  %s741_s5 = inlined_call_operand.vmem [shape: bf16[128,128], index: 5, kind: input, shape index: {}]   ;;  %s742_s6 = inlined_call_operand.vmem [shape: f32[1,128], index: 6, kind: input, shape index: {}]   ;;  %s743_s7 = inlined_call_operand.hbm [shape: f32[16,128], index: 7, kind: output, shape index: {}]  }
   0x1   :  { %v516_v0 = vld [vmem:[%s737_s1] sm:$0xff]   ;;  %451 = vmatprep.subr.bf16.mxu0 %v565_v1  ;;  %471 = vmatprep.subr.bf16.mxu1 %v565_v1  ;;  %v517_v2 = vld [vmem:[%s737_s1 + $0x8] sm:$0xff]   ;;  %v518_v3 = vld [vmem:[%s737_s1 + $0x10] sm:$0xff]  }
   0x2   :  { %452 = vmatpush3.bf16.msra.mxu0 %v516_v0  ;;  %467 = vmatprep.mubr.msk.bf16.mxu0 %vm566_vm0, %v565_v1  ;;  %v525_v4 = vld [vmem:[%s739_s3] sm:$0xff]   ;;  %v519_v5 = vld [vmem:[%s737_s1 + $0x18] sm:$0xff]   ;;  %v526_v6 = vld [vmem:[%s739_s3 + $0x8] sm:$0xff]  }
   0x3   :  { %453 = vmatprep.subr.bf16.mxu0 %v565_v1  ;;  %487 = vmatprep.mubr.msk.bf16.mxu1 %vm566_vm0, %v565_v1  ;;  %v520_v7 = vld [vmem:[%s737_s1 + $0x20] sm:$0xff]   ;;  %v527_v8 = vld [vmem:[%s739_s3 + $0x10] sm:$0xff]   ;;  %v521_v9 = vld [vmem:[%s737_s1 + $0x28] sm:$0xff]  }
   0x4   :  { %472 = vmatpush3.bf16.msra.mxu1 %v525_v4  ;;  %v528_v10 = vld [vmem:[%s739_s3 + $0x18] sm:$0xff]   ;;  %v522_v11 = vld [vmem:[%s737_s1 + $0x30] sm:$0xff]  }
   0x5   :  { %473 = vmatprep.subr.bf16.mxu1 %v565_v1 }
   0x6   :  { %454 = vmatpush3.bf16.msra.mxu0 %v517_v2 }
   0x7   :  { %455 = vmatprep.subr.bf16.mxu0 %v565_v1 }
   0x8   :  { %474 = vmatpush3.bf16.msra.mxu1 %v526_v6 }
   0x9   :  { %475 = vmatprep.subr.bf16.mxu1 %v565_v1 }
   0xa   :  { %456 = vmatpush3.bf16.msra.mxu0 %v518_v3 }
   0xb   :  { %457 = vmatprep.subr.bf16.mxu0 %v565_v1 }
   0xc   :  { %476 = vmatpush3.bf16.msra.mxu1 %v527_v8 }
   0xd   :  { %477 = vmatprep.subr.bf16.mxu1 %v565_v1 }
   0xe   :  { %458 = vmatpush3.bf16.msra.mxu0 %v519_v5 }
   0xf   :  { %459 = vmatprep.subr.bf16.mxu0 %v565_v1 }
  0x12   :  { %460 = vmatpush3.bf16.msra.mxu0 %v520_v7 }
  0x13   :  { %461 = vmatprep.subr.bf16.mxu0 %v565_v1 }
  0x16   :  { %462 = vmatpush3.bf16.msra.mxu0 %v521_v9 }
  0x17   :  { %12 = vsyncpa [#allocation3], 0  ;;  %463 = vmatprep.subr.bf16.mxu0 %v565_v1  ;;  %478 = vmatpush3.bf16.msra.mxu1 %v528_v10  ;;  %v529_v12 = vld [vmem:[%s739_s3 + $0x20] sm:$0xff]   ;;  %v523_v13 = vld [vmem:[%s737_s1 + $0x38] sm:$0xff]  }
  0x18   :  { %479 = vmatprep.subr.bf16.mxu1 %v565_v1  ;;  %v530_v14 = vld [vmem:[%s739_s3 + $0x28] sm:$0xff]   ;;  %v524_v15 = vld [vmem:[%s736_s0] sm:$0xff]   ;;  %v531_v16 = vld [vmem:[%s739_s3 + $0x30] sm:$0xff]  }
  0x19   :  { %v532_v17 = vld [vmem:[%s739_s3 + $0x38] sm:$0xff]   ;;  %v533_v18 = vld [vmem:[%s741_s5] sm:$0xff]   ;;  %v534_v19 = vld [vmem:[%s741_s5 + $0x8] sm:$0xff]  }
  0x1a   :  { %464 = vmatpush3.bf16.msra.mxu0 %v522_v11  ;;  %v535_v20 = vld [vmem:[%s741_s5 + $0x10] sm:$0xff]   ;;  %v536_v21 = vld [vmem:[%s741_s5 + $0x18] sm:$0xff]   ;;  %v537_v22 = vld [vmem:[%s741_s5 + $0x20] sm:$0xff]  }
  0x1b   :  { %465 = vmatprep.subr.bf16.mxu0 %v565_v1  ;;  %480 = vmatpush3.bf16.msra.mxu1 %v529_v12  ;;  %v538_v23 = vld [vmem:[%s741_s5 + $0x28] sm:$0xff]   ;;  %v396_v24 = vld [vmem:[%s738_s2] ss:$0 sm:$0xff]  ;;  %v539_v34 = vld [vmem:[%s741_s5 + $0x30] sm:$0xff]  }
  0x1c   :  { %481 = vmatprep.subr.bf16.mxu1 %v565_v1  ;;  %v540_v35 = vld [vmem:[%s741_s5 + $0x38] sm:$0xff]   ;;  %v406_v36 = vld [vmem:[%s740_s4] ss:$0 sm:$0xff]  ;;  %s567_s5 = smov [#allocation2]  }
  0x1d   :  { %v415_v46 = vld [vmem:[%s742_s6] ss:$0 sm:$0xff]  ;;  %s385_s30 = sshll.u32 %s567_s5, 4  ;;  %s386_s30 = int_to_ptr.vmem [resolvable:$true] %s385_s30 }
  0x1e   :  { %466 = vmatpush3.bf16.msra.mxu0 %v523_v13  ;;  %s541_s4 = scalar_lea.vmem %s386_s30, 256  ;;  %p546_p1 = scmp.lt.s32.totalorder %s386_s30, %s386_s30 }
  0x1f   :  { %482 = vmatpush3.bf16.msra.mxu1 %v530_v14  ;;  %491 = vmatprep.subr.bf16.mxu0 %v565_v1  ;;  %p542_p0 = scmp.ne.s32.totalorder %s386_s30, %s541_s4  ;;  %p547_p2 = scmp.lt.s32.totalorder %s541_s4, %s541_s4 }
  0x20   :  { %483 = vmatprep.subr.bf16.mxu1 %v565_v1 }
  0x21   :  { %468 = vmatmul.mubr.bf16.vlgmr.msra.gmra.mrb[0].mxu0 %v524_v15  ;;  %p548_p3 = por %p547_p2, %p546_p1 }
  0x22   :  { %507 = vmatprep.mubr.msk.bf16.mxu0 %vm566_vm0, %v565_v1  ;;  %492 = vmatpush3.bf16.msra.mxu0 %v533_v18 }
  0x23   :  { %484 = vmatpush3.bf16.msra.mxu1 %v531_v16  ;;  %493 = vmatprep.subr.bf16.mxu0 %v565_v1  ;;  %p549_p4 = pnand %p548_p3, %p542_p0 }
  0x24   :  { %485 = vmatprep.subr.bf16.mxu1 %v565_v1 }
  0x26   :  { %494 = vmatpush3.bf16.msra.mxu0 %v534_v19 }
  0x27   :  { %486 = vmatpush3.bf16.msra.mxu1 %v532_v17  ;;  %495 = vmatprep.subr.bf16.mxu0 %v565_v1 }
  0x2a   :  { %496 = vmatpush3.bf16.msra.mxu0 %v535_v20 }
  0x2b   :  { %497 = vmatprep.subr.bf16.mxu0 %v565_v1 }
  0x2e   :  { %498 = vmatpush3.bf16.msra.mxu0 %v536_v21 }
  0x2f   :  { %499 = vmatprep.subr.bf16.mxu0 %v565_v1 }
  0x32   :  { %500 = vmatpush3.bf16.msra.mxu0 %v537_v22 }
  0x33   :  { %501 = vmatprep.subr.bf16.mxu0 %v565_v1 }
  0x36   :  { %502 = vmatpush3.bf16.msra.mxu0 %v538_v23 }
  0x37   :  { %503 = vmatprep.subr.bf16.mxu0 %v565_v1 }
  0x3a   :  { %504 = vmatpush3.bf16.msra.mxu0 %v539_v34 }
  0x3b   :  { %505 = vmatprep.subr.bf16.mxu0 %v565_v1 }
  0x3e   :  { %506 = vmatpush3.bf16.msra.mxu0 %v540_v35 }
  0xf4   :  { %v141_v25 = vpop.f32.mrb[0].mxu0 }
  0xf5   :  { %v142_v26 = vadd.f32 %v396_v24, %v141_v25  ;;  %v469_v27 = vpop.f32.mrb[1].mxu0 }
  0xf6   :  { %v144_v28 = vpop.f32.mrb[2].mxu0 }
  0xf7   :  { %v145_v29 = vadd.f32 %v396_v24, %v144_v28  ;;  %v470_v30 = vpop.f32.mrb[3].mxu0  ;;  %v148_v31 = vmax.f32 %v142_v26, 0.0 }
  0xf9   :  { %v149_v32 = vmax.f32 %v145_v29, 0.0 }
  0xfb   :  { %v150_v33 = vpack.c.bf16 %v149_v32, %v148_v31 }
  0xfd   :  { %488 = vmatmul.mubr.bf16.vlgmr.msra.gmra.mrb[0].mxu1 %v150_v33 }
 0x1d0   :  { %v256_v37 = vpop.f32.mrb[0].mxu1 }
 0x1d1   :  { %v257_v38 = vadd.f32 %v406_v36, %v256_v37  ;;  %v489_v39 = vpop.f32.mrb[1].mxu1 }
 0x1d2   :  { %v259_v40 = vpop.f32.mrb[2].mxu1 }
 0x1d3   :  { %v260_v41 = vadd.f32 %v406_v36, %v259_v40  ;;  %v490_v42 = vpop.f32.mrb[3].mxu1  ;;  %v263_v43 = vmax.f32 %v257_v38, 0.0 }
 0x1d5   :  { %v264_v44 = vmax.f32 %v260_v41, 0.0 }
 0x1d7   :  { %v265_v45 = vpack.c.bf16 %v264_v44, %v263_v43 }
 0x1d9   :  { %508 = vmatmul.mubr.bf16.vlgmr.msra.gmra.mrb[4].mxu0 %v265_v45 }
 0x2ac   :  { %v371_v47 = vpop.f32.mrb[4].mxu0 }
 0x2ad   :  { %v372_v48 = vadd.f32 %v415_v46, %v371_v47  ;;  %v509_v49 = vpop.f32.mrb[5].mxu0 }
 0x2ae   :  { %v374_v50 = vpop.f32.mrb[6].mxu0 }
 0x2af   :  { %378 = vst [vmem:[#allocation2] sm:$0xff] %v372_v48  ;;  %v375_v51 = vadd.f32 %v415_v46, %v374_v50  ;;  %v510_v52 = vpop.f32.mrb[7].mxu0 }
 0x2b1   :  { %379 = vst [vmem:[#allocation2 + $0x8] sm:$0xff] %v375_v51 }
 0x2b2   :  { %552 = shalt.err (!%p549_p4)
}
 0x2b3   :  { %s553_s8 = scalar_lea.hbm %s743_s7, 256 }
 0x2b4   :  { %p554_p5 = scmp.ne.s32.totalorder %s743_s7, %s553_s8  ;;  %p557_p6 = scmp.lt.u32.totalorder %s553_s8, %s743_s7 }
 0x2b6   :  { %p559_p7 = pnand %p557_p6, %p554_p5 }
 0x2b8   :  { %562 = shalt.err (!%p559_p7)
}
 0x2b9   :  { %s568_s12 = smov 128   ;;  %s569_s13 = smov 8  }
 0x2ba   :  { %391 = dma.vmem_to_hbm [thread:$0]  %s386_s30, 256, %s743_s7, [#allocation3], %s568_s12, %s568_s12, %s569_s13  }
 0x2bb   :  { %563 = dma.done.wait [#allocation3], 256  }
 0x2bc   :  { %564 = vsyncadd [#allocation3], 4294967040 }
 0x2bd   :  { %395 = vsyncpa [#allocation3], 1 }

</bundles_post_ra>
